<compile_context>
chip_gen: v5e
topology: v5e:2x2
jax: 0.10.0
libtpu: 0.0.40
codegen_flags: <defaults>
</compile_context>

<pallas_src>
import jax
import jax.numpy as jnp
from jax.experimental import pallas as pl
from jax.experimental.pallas import tpu as pltpu


def _patch_embed_kernel(x_ref, w_ref, pe_ref, o_ref):
    # x_ref : (TM, P2)     TM = TB*N flattened patch rows (TB batch elements)
    # w_ref : (P2, E_pad)  projection weight, zero-padded to lane-dense width
    # pe_ref: (TM, E_pad)  pos_embed (+ bias) tiled to the TM-row period
    # o_ref : (TM, E_pad)
    y = jnp.dot(x_ref[...], w_ref[...], preferred_element_type=jnp.float32)
    o_ref[...] = (y + pe_ref[...]).astype(o_ref.dtype)


def patch_embedding(x, weight, bias, pos_embed, patch_size,
                    *, target_block_bytes=2 * 1024 * 1024):
    """x: (B, 1, H, W) f32.  weight: (p*p, E) (= torch W.T).  bias: (E,).
    pos_embed: (1, N, E).  Returns (B, N, E)."""
    B, C, H, W = x.shape
    assert C == 1, "PyTorch module's pos_embed broadcast requires C == 1"
    p = patch_size
    nH, nW = H // p, W // p
    N = nH * nW
    P2 = p * p
    E = weight.shape[1]
    E_pad = max(128, ((E + 127) // 128) * 128)     # lane-dense output width

    # --- unfold glue: (B,1,H,W) -> (B*N, P2) patch row matrix ----------------
    # allow_input_fusion below lets XLA fuse this transpose into the pallas
    # input DMA instead of a separate HBM round trip.
    patches = x.reshape(B, nH, p, nW, p).transpose(0, 1, 3, 2, 4).reshape(B * N, P2)

    # --- pad embed dim to 128 lanes; fold bias into pos_embed ----------------
    w_pad = jnp.zeros((P2, E_pad), weight.dtype).at[:, :E].set(weight)
    pe_row = jnp.zeros((N, E_pad), pos_embed.dtype).at[:, :E].set(
        pos_embed.reshape(N, E) + bias.reshape(1, E))

    # --- row tiling: TB batch elements (TM = TB*N rows) per grid step --------
    # target_block_bytes can be raised on v6e/v5e (128 MiB VMEM) for bigger tiles.
    per_b_bytes = N * (P2 + 2 * E_pad) * x.dtype.itemsize
    TB = max(1, min(B, target_block_bytes // max(per_b_bytes, 1)))
    while B % TB:                       # TB must divide B
        TB -= 1
    if B >= 2 and TB == B:              # keep >=2 'parallel' steps (v7x: 2 TCs)
        TB = B // 2
        while B % TB:
            TB -= 1
    TM = TB * N
    num_tiles = (B * N) // TM

    # pos_embed repeats with period N along the flattened rows -> identical
    # (TM, E_pad) block for every grid step.
    pe_tile = jnp.tile(pe_row, (TB, 1))

    out = pl.pallas_call(
        _patch_embed_kernel,
        out_shape=jax.ShapeDtypeStruct((B * N, E_pad), x.dtype),
        grid_spec=pltpu.PrefetchScalarGridSpec(
            num_scalar_prefetch=0,
            grid=(num_tiles,),
            in_specs=[
                pl.BlockSpec((TM, P2), lambda i: (i, 0)),
                pl.BlockSpec((P2, E_pad), lambda i: (0, 0)),
                pl.BlockSpec((TM, E_pad), lambda i: (0, 0)),
            ],
            out_specs=pl.BlockSpec((TM, E_pad), lambda i: (i, 0)),
        ),
        compiler_params=pltpu.CompilerParams(
            dimension_semantics=("parallel",),
            vmem_limit_bytes=32 * 1024 * 1024,
            allow_input_fusion=(True, False, False),
        ),
    )(patches, w_pad, pe_tile)

    return out[:, :E].reshape(B, N, E)


if __name__ == "__main__":
    # Small shapes consistent with the module: img_size=16, patch_size=4,
    # embed_dim=32, single channel, batch=8 (so the row-tile heuristic yields
    # multiple grid steps).
    img_size, patch_size, embed_dim = 16, 4, 32
    B, C = 8, 1
    N = (img_size // patch_size) ** 2
    P2 = patch_size * patch_size

    key = jax.random.PRNGKey(0)
    kx, kw, kb, kp = jax.random.split(key, 4)
    x = jax.random.normal(kx, (B, C, img_size, img_size), dtype=jnp.float32)
    # nn.Linear(P2, E): weight stored here directly as (in, out) = W.T
    weight = jax.random.normal(kw, (P2, embed_dim), dtype=jnp.float32) * 0.1
    bias = jax.random.normal(kb, (embed_dim,), dtype=jnp.float32) * 0.1
    pos_embed = jax.random.normal(kp, (1, N, embed_dim), dtype=jnp.float32)

    out = patch_embedding(x, weight, bias, pos_embed, patch_size)
    out = jax.block_until_ready(out)

    # Pure-JAX reference of the same forward semantics.
    pr = x.reshape(B, img_size // patch_size, patch_size,
                   img_size // patch_size, patch_size)
    pr = pr.transpose(0, 1, 3, 2, 4).reshape(B, N, P2)
    ref = pr @ weight + bias + pos_embed

    assert out.shape == (B, N, embed_dim)
    assert jnp.allclose(out, ref, atol=1e-4, rtol=1e-4)

    print("KERNEL_OK")
</pallas_src>

<mosaic_0001>
module attributes {stable_mosaic.version = 11 : i64} {
  func.func @_patch_embed_kernel(%arg0: i32, %arg1: memref<64x16xf32, #tpu.memory_space<vmem>>, %arg2: memref<16x128xf32, #tpu.memory_space<vmem>>, %arg3: memref<64x128xf32, #tpu.memory_space<vmem>>, %arg4: memref<64x128xf32, #tpu.memory_space<vmem>>) attributes {dimension_semantics = [#tpu.dimension_semantics<parallel>], iteration_bounds = array<i64: 2>, scalar_prefetch = 0 : i64, scratch_operands = 0 : i64, tpu.core_type = #tpu.core_type<tc>, window_params = [{transform_indices = @transform_0, window_bounds = array<i64: 64, 16>}, {pipeline_mode = #tpu.pipeline_mode<synchronous>, transform_indices = @transform_1, window_bounds = array<i64: 16, 128>}, {pipeline_mode = #tpu.pipeline_mode<synchronous>, transform_indices = @transform_2, window_bounds = array<i64: 64, 128>}, {transform_indices = @transform_3, window_bounds = array<i64: 64, 128>}]} {
    %c0 = arith.constant 0 : index
    %c0_0 = arith.constant 0 : index
    %0 = vector.load %arg1[%c0, %c0_0] : memref<64x16xf32, #tpu.memory_space<vmem>>, vector<64x16xf32>
    %c0_1 = arith.constant 0 : index
    %c0_2 = arith.constant 0 : index
    %1 = vector.load %arg2[%c0_1, %c0_2] : memref<16x128xf32, #tpu.memory_space<vmem>>, vector<16x128xf32>
    %cst = arith.constant dense<0.000000e+00> : vector<64x128xf32>
    %2 = tpu.matmul %0, %1, %cst {dimension_numbers = #tpu.dot_dimension_numbers<[1], [0], [0], [1], [0, 0, 1, 1], [], []>} : vector<64x16xf32>, vector<16x128xf32>, vector<64x128xf32> -> vector<64x128xf32>
    %c0_3 = arith.constant 0 : index
    %c0_4 = arith.constant 0 : index
    %3 = vector.load %arg3[%c0_3, %c0_4] : memref<64x128xf32, #tpu.memory_space<vmem>>, vector<64x128xf32>
    %4 = arith.addf %2, %3 : vector<64x128xf32>
    %c0_5 = arith.constant 0 : index
    %c0_6 = arith.constant 0 : index
    %5 = vector.load %arg4[%c0_5, %c0_6] : memref<64x128xf32, #tpu.memory_space<vmem>>, vector<64x128xf32>
    tpu.vector_store %arg4[%c0_5, %c0_6], %4 {strides = array<i32>} : memref<64x128xf32, #tpu.memory_space<vmem>>, vector<64x128xf32>,
    return
  }
  func.func @transform_0(%arg0: i32) -> (i32, i32) {
    %c0_i32 = arith.constant 0 : i32
    %c0_i32_0 = arith.constant 0 : i32
    return %arg0, %c0_i32 : i32, i32
  }
  func.func @transform_1(%arg0: i32) -> (i32, i32) {
    %c0_i32 = arith.constant 0 : i32
    %c0_i32_0 = arith.constant 0 : i32
    %c0_i32_1 = arith.constant 0 : i32
    return %c0_i32, %c0_i32_0 : i32, i32
  }
  func.func @transform_2(%arg0: i32) -> (i32, i32) {
    %c0_i32 = arith.constant 0 : i32
    %c0_i32_0 = arith.constant 0 : i32
    %c0_i32_1 = arith.constant 0 : i32
    return %c0_i32, %c0_i32_0 : i32, i32
  }
  func.func @transform_3(%arg0: i32) -> (i32, i32) {
    %c0_i32 = arith.constant 0 : i32
    %c0_i32_0 = arith.constant 0 : i32
    return %arg0, %c0_i32 : i32, i32
  }
}

</mosaic_0001>

<bundles_post_ra>
// kernel: tpu_custom_call.1
= control target key start
LH: loop header
LB: loop body
LE: loop exit
PB: predicated region body
PF: predicated region fallthrough
CT: control target
= control target key end

     0   :  { %8 = vsyncpa [#allocation3], 0  ;;  %s633_s0 = inlined_call_operand.vmem [shape: f32[128,16], index: 0, kind: input, shape index: {}]   ;;  %s634_s1 = inlined_call_operand.vmem [shape: f32[16,128], index: 1, kind: input, shape index: {}]   ;;  %s635_s2 = inlined_call_operand.vmem [shape: f32[64,128], index: 2, kind: input, shape index: {}]   ;;  %s636_s3 = inlined_call_operand.hbm [shape: f32[128,128], index: 3, kind: output, shape index: {}]  }
   0x1   :  { %10 = vsyncpa [#allocation3 + $0x1], 0  ;;  %s496_s12 = smov 0   ;;  %s498_s13 = smov 0  }
   0x2   :  { %s500_s14 = smov 0   ;;  %s502_s15 = smov 0  }
   0x3 LB: > { %s517_s16 = sadd.s32 4294967295, %s472_s15   ;;  %s342_s17 = sadd.s32 4294967294, %s472_s15   ;;  %s472_s15 = sphi %s502_s15, %s642_s15   ;;  %s468_s14 = sphi %s500_s14, %s641_s14   ;;  %s464_s13 = sphi %s498_s13, %s640_s13   ;;  %s460_s12 = sphi %s496_s12, %s639_s12  }
   0x4   : > { %s521_s18 = sadd.s32 1, %s472_s15   ;;  %s91_s19 = sadd.s32 1, %s468_s14 }
   0x5   : > { %s88_s20 = ssub.s32 %s472_s15, %s521_s18  ;;  %p101_p0 = scmp.ne.s32.totalorder %s468_s14, %s464_s13 }
   0x6   : > { %p89_p1 = scmp.eq.s32.totalorder %s88_s20, 0  ;;  %p102_p2 = scmp.eq.s32.totalorder %s517_s16, 1 }
   0x7   : > { %p107_p3 = scmp.ne.s32.totalorder %s464_s13, %s460_s12  ;;  %p108_p4 = scmp.eq.s32.totalorder %s342_s17, 1 }
   0x8   : > { %s532_s21 = scalar_select %p89_p1, %s468_s14, %s91_s19  }
   0x9   : > { %p534_p5 = por %p102_p2, %p101_p0  ;;  %p538_p6 = por %p108_p4, %p107_p3 }
   0xa   : > { %p345_p7 = scmp.ge.s32.totalorder %s472_s15, 1  ;;  %p141_p8 = scmp.lt.s32.totalorder %s472_s15, 3 }
   0xc   : > { %p142_p9 = pnand %p345_p7, %p141_p8 }
   0xd   : > { %s347_s28 = sshll.u32 (!%p142_p9), %s517_s16, 3  ;;  %s162_s6 = sand.u32 (!%p142_p9), 1, %s464_s13  }
   0xe   : > { %145 = sbr.rel (%p142_p9) target bundleno = 171 (0xab), region = 32  ;;  %p166_p10 = scmp.lt.s32.totalorder (!%p142_p9), %s347_s28, 15 }
   0xf   : > { %s346_s7 = sshll.u32 (!%p142_p9), %s162_s6, 6  ;;  %s362_s26 = sshll.u32 (!%p142_p9), %s517_s16, 6 }
  0x10   : > { %s571_s17 = scalar_lea.vmem (!%p142_p9), [#allocation2], %s346_s7  ;;  %s276_s7 = scalar_lea.hbm (!%p142_p9), %s636_s3, %s362_s26 }
  0x11   : > { %s277_s11 = sshll.u32 (!%p142_p9), %s571_s17, 4  ;;  %s279_s19 = sshll.u32 (!%p142_p9), %s276_s7, 4  ;;  %s278_s11 = int_to_ptr.vmem [resolvable:$true] %s277_s11  ;;  %s280_s19 = int_to_ptr.hbm [resolvable:$true] %s279_s19 }
  0x12   : > { %s265_s20 = scalar_lea.sflag (!%p142_p9), [#allocation3], %s162_s6  ;;  %s424_s24 = sshra.s32 (!%p142_p9), %s280_s19, 4  ;;  %s425_s24 = int_to_ptr.hbm [resolvable:$true] %s424_s24 }
  0x13   : > { %v181_v0 = vld [vmem:[%s634_s1 + $0x8] sm:$0xff]  ;;  %v180_v1 = vld [vmem:[%s634_s1] sm:$0xff]  ;;  %s644_s28 = smov (!%p166_p10, %s347_s28), 15  ;;  %vm190_vm0 = vcmask 130048   ;;  %v184_v11 = vld [vmem:[%s635_s2 + $0x10] sm:$0xff]  ;;  %s426_s25 = scalar_lea.hbm %s425_s24, 64 }
  0x14   : > { %364 = vmatpush.msra.mxu2 %v181_v0  ;;  %365 = vmatpush.msra.mxu3 %v181_v0  ;;  %s348_s29 = sshll.u32 %s644_s28, 3  ;;  %v182_v10 = vld [vmem:[%s635_s2] sm:$0xff]  ;;  %v188_v17 = vld [vmem:[%s635_s2 + $0x30] sm:$0xff]  ;;  %v183_v22 = vld [vmem:[%s635_s2 + $0x8] sm:$0xff]  ;;  %p427_p11 = scmp.ne.s32.totalorder %s425_s24, %s426_s25 }
  0x15   : > { %229 = vmatpush.msra.mxu0 %v181_v0  ;;  %363 = vmatpush.msra.mxu1 %v181_v0  ;;  %s169_s5 = scalar_lea.vmem %s633_s0, %s348_s29  ;;  %v186_v16 = vld [vmem:[%s635_s2 + $0x20] sm:$0xff]  ;;  %v185_v23 = vld [vmem:[%s635_s2 + $0x18] sm:$0xff]  ;;  %v187_v28 = vld [vmem:[%s635_s2 + $0x28] sm:$0xff]  ;;  %s430_s28 = scalar_lea.hbm %s636_s3, 128 }
  0x16   : > { %367 = vmatpush.msra.mxu2 %v180_v1  ;;  %368 = vmatpush.msra.mxu3 %v180_v1  ;;  %v176_v2 = vld [vmem:[%s169_s5 + $0x20] sm:$0xff]  ;;  %v178_v3 = vld [vmem:[%s169_s5 + $0x30] sm:$0xff]  ;;  %v177_v6 = vld [vmem:[%s169_s5 + $0x28] sm:$0xff]  ;;  %p428_p12 = pnand %p427_p11, %p534_p5  ;;  %p431_p0 = scmp.lt.s32.totalorder %s425_s24, %s636_s3 }
  0x17   : > { %230 = vmatpush.msra.mxu0 %v180_v1  ;;  %366 = vmatpush.msra.mxu1 %v180_v1  ;;  %v172_v4 = vld [vmem:[%s169_s5] sm:$0xff]  ;;  %v174_v5 = vld [vmem:[%s169_s5 + $0x10] sm:$0xff]  ;;  %v179_v7 = vld [vmem:[%s169_s5 + $0x38] sm:$0xff]  ;;  %p432_p1 = scmp.lt.s32.totalorder %s430_s28, %s426_s25 }
  0x18   : > { %353 = vmatmul.msk.f32.vlgmr.msra.gmra.mxu2 %vm190_vm0, %v176_v2  ;;  %355 = vmatmul.msk.f32.vlgmr.msra.gmra.mxu3 %vm190_vm0, %v178_v3  ;;  %v173_v8 = vld [vmem:[%s169_s5 + $0x8] sm:$0xff]  ;;  %v175_v9 = vld [vmem:[%s169_s5 + $0x18] sm:$0xff]  ;;  %p429_p13 = pneg %p428_p12 }
  0x19   : > { %349 = vmatmul.msk.f32.vlgmr.msra.gmra.mxu0 %vm190_vm0, %v172_v4  ;;  %351 = vmatmul.msk.f32.vlgmr.msra.gmra.mxu1 %vm190_vm0, %v174_v5  ;;  %v189_v29 = vld [vmem:[%s635_s2 + $0x38] sm:$0xff]  ;;  %p433_p2 = por %p432_p1, %p431_p0 }
  0x1b   : > { %p434_p3 = pnand %p433_p2, %p429_p13 }
  0x20   : > { %354 = vmatmul.msk.f32.gmra.mxu2 %vm190_vm0, %v177_v6  ;;  %356 = vmatmul.msk.f32.gmra.mxu3 %vm190_vm0, %v179_v7 }
  0x21   : > { %350 = vmatmul.msk.f32.gmra.mxu0 %vm190_vm0, %v173_v8  ;;  %352 = vmatmul.msk.f32.gmra.mxu1 %vm190_vm0, %v175_v9 }
  0x96   : > { %v232_v12 = vpop.f32.mrf.mxu0  ;;  %v238_v13 = vpop.f32.mrf.mxu1 }
  0x97   : > { %v233_v14 = vadd.f32 %v232_v12, %v182_v10  ;;  %v239_v15 = vadd.f32 %v238_v13, %v184_v11 }
  0x99   : > { %256 = vst [vmem:[%s571_s17] sm:$0xff] %v233_v14 }
  0x9a   : > { %258 = vst [vmem:[%s571_s17 + $0x10] sm:$0xff] %v239_v15 }
  0x9b   : > { %v244_v18 = vpop.f32.mrf.mxu2  ;;  %v250_v19 = vpop.f32.mrf.mxu3 }
  0x9c   : > { %v245_v20 = vadd.f32 %v244_v18, %v186_v16  ;;  %v251_v21 = vadd.f32 %v250_v19, %v188_v17 }
  0x9e   : > { %260 = vst [vmem:[%s571_s17 + $0x20] sm:$0xff] %v245_v20  ;;  %v235_v24 = vpop.f32.mrf.mxu0  ;;  %v241_v25 = vpop.f32.mrf.mxu1 }
  0x9f   : > { %262 = vst [vmem:[%s571_s17 + $0x30] sm:$0xff] %v251_v21  ;;  %v236_v26 = vadd.f32 %v235_v24, %v183_v22  ;;  %v242_v27 = vadd.f32 %v241_v25, %v185_v23 }
  0xa1   : > { %257 = vst [vmem:[%s571_s17 + $0x8] sm:$0xff] %v236_v26 }
  0xa2   : > { %259 = vst [vmem:[%s571_s17 + $0x18] sm:$0xff] %v242_v27 }
  0xa3   : > { %v247_v30 = vpop.f32.mrf.mxu2  ;;  %v253_v31 = vpop.f32.mrf.mxu3 }
  0xa4   : > { %v248_v32 = vadd.f32 %v247_v30, %v187_v28  ;;  %v254_v33 = vadd.f32 %v253_v31, %v189_v29 }
  0xa6   : > { %261 = vst [vmem:[%s571_s17 + $0x28] sm:$0xff] %v248_v32 }
  0xa7   : > { %263 = vst [vmem:[%s571_s17 + $0x38] sm:$0xff] %v254_v33 }
  0xa8   : > { %437 = shalt.err (!%p434_p3)
}
  0xa9   : > { %s474_s6 = smov 128   ;;  %s475_s17 = smov 8  }
  0xaa   : > { %369 = dma.vmem_to_hbm [thread:$0]  (%p534_p5), %s278_s11, 1024, %s280_s19, %s265_s20, %s474_s6, %s474_s6, %s475_s17  }
  0xab PF: > { %p375_p4 = scmp.ge.s32.totalorder %s472_s15, 2  ;;  %s294_s4 = sand.u32 1, %s460_s12  }
  0xac   : > { %s295_s5 = scalar_lea.sflag [#allocation3], %s294_s4 }
  0xad   : > { %p372_p7 = pnand %p375_p4, %p538_p6 }
  0xaf   : > { %p373_p8 = pneg %p372_p7 }
  0xb1   : > { %455 = dma.done.wait (%p373_p8), %s295_s5, 1024  }
  0xb2   : > { %457 = vsyncadd (%p373_p8), %s295_s5, 4294966272  ;;  %p13_p9 = scmp.ge.s32.totalorder %s521_s18, 4   ;;  %s639_s12 = smov %s464_s13 }
  0xb3   : > { %s640_s13 = smov %s468_s14  ;;  %s641_s14 = smov %s532_s21 }
  0xb4   : > { %s642_s15 = smov %s521_s18  ;;  %15 = sbr.rel (!%p13_p9) target bundleno = 3 (0x3), region = 67 }
  0xb9   :  { %301 = vsyncpa [#allocation3], 1 }
  0xba   :  { %303 = vsyncpa [#allocation3 + $0x1], 1 }

</bundles_post_ra>
